<compile_context>
chip_gen: v7x
topology: tpu7x:2x2x1
jax: 0.10.0
libtpu: 0.0.40
codegen_flags: <defaults>
</compile_context>

<pallas_src>
import functools

import numpy as np
import jax
import jax.numpy as jnp
from jax.experimental import pallas as pl
from jax.experimental.pallas import tpu as pltpu

LANE = 128
NUM_CLASSES = 2
NEG_INF_PAD = -1e30

_VMEM = pl.BlockSpec(memory_space=pltpu.MemorySpace.VMEM)


# ----------------------------- fused Pallas kernel ---------------------------

def _fused_kernel(idx_ref,                      # SMEM [B] int32 (scalar prefetch)
                  a_ref,                        # [N,N]   bf16
                  x_ref,                        # [N,128] bf16 (Fin zero-padded)
                  w_ref,                        # [5,128,128] bf16 packed weights
                  b_ref,                        # [8,128] f32 packed biases
                  out_ref,                      # [8,128] f32 packed output
                  hcat_ref,                     # VMEM scratch [N,128] f32
                  rows_ref,                     # VMEM scratch [8,128] f32
                  *, num_graphs, out_rows):
    a = a_ref[...]                                            # bf16 [N,N]

    # GCN layer 1: tanh((A @ X) @ W1 + b1); output lives in lanes 0:32.
    ax = jnp.dot(a, x_ref[...], preferred_element_type=jnp.float32)
    h1 = jnp.tanh(
        jnp.dot(ax.astype(jnp.bfloat16), w_ref[0],
                preferred_element_type=jnp.float32) + b_ref[0:1, :])

    # GCN layers 2,3: tanh(A @ (H @ W) + b); weights are lane-offset packed so
    # layer l's output lands directly in lanes [32*l, 32*(l+1)).
    def gcn(h, layer):
        hw = jnp.dot(h.astype(jnp.bfloat16), w_ref[layer],
                     preferred_element_type=jnp.float32)
        agg = jnp.dot(a, hw.astype(jnp.bfloat16),
                      preferred_element_type=jnp.float32)
        return jnp.tanh(agg + b_ref[layer:layer + 1, :])

    h2 = gcn(h1, 1)
    h3 = gcn(h2, 2)

    # "concat": layer outputs already occupy disjoint lanes -> two VPU adds.
    hcat_ref[...] = h1 + h2 + h3                              # [N,128] f32

    # First-node-per-graph readout gather using scalar-prefetched indices.
    rows_ref[...] = jnp.zeros_like(rows_ref)
    for i in range(num_graphs):                               # B is tiny
        rows_ref[pl.ds(i, 1), :] = hcat_ref[pl.ds(idx_ref[i], 1), :]
    rows = rows_ref[...]                                      # [8,128] f32

    # Head on the B readout rows only: linear1 -> relu -> linear2 -> log_softmax.
    hidden = jnp.dot(rows.astype(jnp.bfloat16), w_ref[3],
                     preferred_element_type=jnp.float32) + b_ref[3:4, :]
    hr = jnp.maximum(hidden, 0.0)
    # TODO(synk): dropout path (with_dropout=True) not implemented; module default is False.
    z = jnp.dot(hr.astype(jnp.bfloat16), w_ref[4],
                preferred_element_type=jnp.float32) + b_ref[4:5, :]
    m = jnp.max(z, axis=1, keepdims=True)
    lse = jnp.log(jnp.sum(jnp.exp(z - m), axis=1, keepdims=True)) + m
    logits = z - lse

    # Single unmasked full-tile store: rows 0:B feature, rows B:2B logits.
    pieces = [hidden[0:num_graphs, :], logits[0:num_graphs, :]]
    pad_rows = out_rows - 2 * num_graphs
    if pad_rows > 0:
        pieces.append(jnp.zeros((pad_rows, LANE), jnp.float32))
    out_ref[...] = jnp.concatenate(pieces, axis=0)


# ------------------------------ JAX wrappers ---------------------------------

def fused_forward(a_bf16, x_pad, idx, prep, *, hidden_size,
                  num_classes=NUM_CLASSES):
    n = x_pad.shape[0]
    b = idx.shape[0]
    rows_pad = max(8, ((b + 7) // 8) * 8)
    out_rows = max(8, ((2 * b + 7) // 8) * 8)

    # Advisory cost for XLA scheduling of surrounding glue ops.
    flops = 2 * (n * n * LANE + n * LANE * LANE
                 + 2 * (n * LANE * LANE + n * n * LANE)
                 + 2 * rows_pad * LANE * LANE)
    transcendentals = 3 * n * LANE + rows_pad * LANE + rows_pad
    bytes_accessed = (n * n * 2 + n * LANE * 2 + 5 * LANE * LANE * 2
                      + 8 * LANE * 4 + out_rows * LANE * 4 + b * 4)

    out = pl.pallas_call(
        functools.partial(_fused_kernel, num_graphs=b, out_rows=out_rows),
        out_shape=jax.ShapeDtypeStruct((out_rows, LANE), jnp.float32),
        grid_spec=pltpu.PrefetchScalarGridSpec(
            num_scalar_prefetch=1,
            grid=(),
            in_specs=[_VMEM, _VMEM, _VMEM, _VMEM],
            out_specs=_VMEM,
            scratch_shapes=[pltpu.VMEM((n, LANE), jnp.float32),
                            pltpu.VMEM((rows_pad, LANE), jnp.float32)],
        ),
        compiler_params=pltpu.CompilerParams(
            vmem_limit_bytes=32 * 1024 * 1024),
        cost_estimate=pl.CostEstimate(flops=flops,
                                      transcendentals=transcendentals,
                                      bytes_accessed=bytes_accessed),
    )(idx, a_bf16, x_pad, prep["wslab"], prep["bslab"])

    feature = out[0:b, 0:hidden_size]
    logits = out[b:2 * b, 0:num_classes]
    return feature, logits


def prepare_params(params, *, hidden_size, num_classes=NUM_CLASSES):
    """Pack all weights into one bf16 [5,128,128] slab (lane-offset GCN
    placement so layer outputs land at their concat offsets) and all biases
    into one f32 [8,128] slab.  One-time host precompute."""
    convs = params["convs"]
    latents = [int(np.asarray(w).shape[1]) for (w, _) in convs]
    offs = [0] + list(np.cumsum(latents))                 # [0,32,64,96]
    assert offs[-1] <= LANE and hidden_size <= LANE and num_classes <= LANE

    wslab = np.zeros((5, LANE, LANE), np.float32)
    bslab = np.zeros((8, LANE), np.float32)

    for l, (w, bias) in enumerate(convs):
        w = np.asarray(w, np.float32)                      # [in, out]
        bias = np.asarray(bias, np.float32).reshape(-1)
        in_off = 0 if l == 0 else offs[l - 1]              # lanes of the input
        out_off = offs[l]                                  # lanes of the output
        wslab[l, in_off:in_off + w.shape[0], out_off:out_off + w.shape[1]] = w
        bslab[l, out_off:out_off + bias.shape[0]] = bias

    wl1 = np.asarray(params["w_lin1"], np.float32)         # [sum(latent), hidden]
    wslab[3, :wl1.shape[0], :wl1.shape[1]] = wl1
    bslab[3, :hidden_size] = np.asarray(params["b_lin1"], np.float32).reshape(-1)

    wl2 = np.asarray(params["w_lin2"], np.float32)          # [hidden, 2]
    wslab[4, :wl2.shape[0], :wl2.shape[1]] = wl2
    bslab[4, :] = NEG_INF_PAD        # pad lanes ignored by in-kernel log_softmax
    bslab[4, :num_classes] = np.asarray(params["b_lin2"], np.float32).reshape(-1)

    return {"wslab": jnp.asarray(wslab, jnp.bfloat16),
            "bslab": jnp.asarray(bslab, jnp.float32)}


def prepare_inputs(a_hat, x):
    """One-time host prep: A_hat -> bf16, X -> zero-padded to 128 lanes, bf16."""
    n, fin = np.asarray(x).shape
    x_pad = np.zeros((n, LANE), np.float32)
    x_pad[:, :fin] = np.asarray(x, np.float32)
    return (jnp.asarray(np.asarray(a_hat, np.float32), jnp.bfloat16),
            jnp.asarray(x_pad, jnp.bfloat16))


def net_forward(a_bf16, x_pad, idx, y, prep, *, hidden_size):
    """Reproduces Net.forward: returns (logits, loss, acc, feature)."""
    feature, logits = fused_forward(a_bf16, x_pad, idx, prep,
                                    hidden_size=hidden_size)
    y = y.astype(jnp.int32)
    loss = -jnp.mean(logits[jnp.arange(logits.shape[0]), y])   # F.nll_loss
    pred = jnp.argmax(logits, axis=1)
    acc = jnp.mean((pred == y).astype(jnp.float32))
    return logits, loss, acc, feature


# --------------------------- host precompute glue ----------------------------

def build_normalized_adj(edge_index, num_nodes):
    """Dense A_hat = D^-1/2 (A + I) D^-1/2 (PyG GCNConv normalization)."""
    a = np.zeros((num_nodes, num_nodes), dtype=np.float32)
    src, dst = np.asarray(edge_index)
    np.add.at(a, (dst, src), 1.0)            # scatter-add (handles duplicates)
    a = a + np.eye(num_nodes, dtype=np.float32)
    deg = a.sum(axis=1)
    dinv = 1.0 / np.sqrt(np.maximum(deg, 1e-12))
    return dinv[:, None] * a * dinv[None, :]


def first_node_per_graph(batch):
    """torch.unique(batch) + first index with batch == graph id."""
    batch = np.asarray(batch)
    ids = np.unique(batch)
    idx = np.array([int(np.nonzero(batch == g)[0][0]) for g in ids],
                   dtype=np.int32)
    return jnp.asarray(idx)


# ---------------------------------- main --------------------------------------

if __name__ == "__main__":
    input_dim = 4
    hidden_size = 32
    latent_dim = [32, 32, 32]
    num_nodes = 16          # 2 graphs x 8 nodes
    num_graphs = 2

    key = jax.random.PRNGKey(0)
    ks = jax.random.split(key, 12)

    def glorot(k, shape):
        limit = np.sqrt(6.0 / (shape[0] + shape[1]))
        return jax.random.uniform(k, shape, jnp.float32, -limit, limit)

    # GCNConv params: W_l [in, out], b_l [1, out]
    dims = [input_dim] + latent_dim
    convs = []
    for i in range(len(latent_dim)):
        w = glorot(ks[2 * i], (dims[i], dims[i + 1]))
        b = jnp.zeros((1, dims[i + 1]), jnp.float32)
        convs.append((w, b))

    total_latent = sum(latent_dim)  # 96
    params = {
        "convs": convs,
        "w_lin1": glorot(ks[6], (total_latent, hidden_size)),
        "b_lin1": 0.01 * jax.random.normal(ks[7], (1, hidden_size), jnp.float32),
        "w_lin2": glorot(ks[8], (hidden_size, 2)),
        "b_lin2": 0.01 * jax.random.normal(ks[9], (1, 2), jnp.float32),
    }

    # Deterministic node features, graph structure, batch vector and labels.
    x = jax.random.normal(ks[10], (num_nodes, input_dim), jnp.float32)

    # Two 8-node ring graphs (undirected edges in both directions).
    src_list, dst_list = [], []
    for g in range(num_graphs):
        base = g * 8
        for i in range(8):
            a_, b_ = base + i, base + (i + 1) % 8
            src_list += [a_, b_]
            dst_list += [b_, a_]
    edge_index = np.stack([np.array(src_list), np.array(dst_list)], axis=0)

    batch = np.repeat(np.arange(num_graphs), 8).astype(np.int32)
    y = jnp.asarray(np.array([0, 1], dtype=np.int32))

    # One-time host precompute (reused across forwards of the same batch).
    a_hat_np = build_normalized_adj(edge_index, num_nodes)
    idx = first_node_per_graph(batch)
    prep = prepare_params(params, hidden_size=hidden_size)
    a_bf16, x_pad = prepare_inputs(a_hat_np, x)

    fwd = jax.jit(functools.partial(net_forward, hidden_size=hidden_size))
    logits, loss, acc, feature = fwd(a_bf16, x_pad, idx, y, prep)
    jax.block_until_ready((logits, loss, acc, feature))

    assert logits.shape == (num_graphs, 2)
    assert feature.shape == (num_graphs, hidden_size)
    assert np.isfinite(np.asarray(loss))
    assert np.all(np.isfinite(np.asarray(logits)))
    print("KERNEL_OK")
</pallas_src>

<mosaic_0001>
module attributes {stable_mosaic.version = 11 : i64} {
  func.func @_fused_kernel(%arg0: memref<2xi32, #tpu.memory_space<smem>>, %arg1: memref<16x16xbf16, #tpu.memory_space<vmem>>, %arg2: memref<16x128xbf16, #tpu.memory_space<vmem>>, %arg3: memref<5x128x128xbf16, #tpu.memory_space<vmem>>, %arg4: memref<8x128xf32, #tpu.memory_space<vmem>>, %arg5: memref<8x128xf32, #tpu.memory_space<vmem>>, %arg6: memref<16x128xf32, #tpu.memory_space<vmem>>, %arg7: memref<8x128xf32, #tpu.memory_space<vmem>>) attributes {dimension_semantics = [], scalar_prefetch = 1 : i64, scratch_operands = 2 : i64, tpu.core_type = #tpu.core_type<tc>} {
    %c0 = arith.constant 0 : index
    %c0_0 = arith.constant 0 : index
    %0 = vector.load %arg1[%c0, %c0_0] : memref<16x16xbf16, #tpu.memory_space<vmem>>, vector<16x16xbf16>
    %c0_1 = arith.constant 0 : index
    %c0_2 = arith.constant 0 : index
    %1 = vector.load %arg2[%c0_1, %c0_2] : memref<16x128xbf16, #tpu.memory_space<vmem>>, vector<16x128xbf16>
    %cst = arith.constant dense<0.000000e+00> : vector<16x128xf32>
    %2 = tpu.matmul %0, %1, %cst {dimension_numbers = #tpu.dot_dimension_numbers<[1], [0], [0], [1], [0, 0, 1, 1], [], []>} : vector<16x16xbf16>, vector<16x128xbf16>, vector<16x128xf32> -> vector<16x128xf32>
    %3 = arith.truncf %2 : vector<16x128xf32> to vector<16x128xbf16>
    %c0_3 = arith.constant 0 : index
    %c0_4 = arith.constant 0 : index
    %c0_5 = arith.constant 0 : index
    %4 = vector.load %arg3[%c0_3, %c0_4, %c0_5] : memref<5x128x128xbf16, #tpu.memory_space<vmem>>, vector<1x128x128xbf16>
    %5 = vector.shape_cast %4 : vector<1x128x128xbf16> to vector<128x128xbf16>
    %cst_6 = arith.constant dense<0.000000e+00> : vector<16x128xf32>
    %6 = tpu.matmul %3, %5, %cst_6 {dimension_numbers = #tpu.dot_dimension_numbers<[1], [0], [0], [1], [0, 0, 1, 1], [], []>} : vector<16x128xbf16>, vector<128x128xbf16>, vector<16x128xf32> -> vector<16x128xf32>
    %c0_7 = arith.constant 0 : index
    %c0_8 = arith.constant 0 : index
    %7 = vector.load %arg4[%c0_7, %c0_8] : memref<8x128xf32, #tpu.memory_space<vmem>>, vector<1x128xf32>
    %8 = vector.broadcast %7 : vector<1x128xf32> to vector<16x128xf32>
    %9 = arith.addf %6, %8 : vector<16x128xf32>
    %10 = math.tanh %9 : vector<16x128xf32>
    %11 = arith.truncf %10 : vector<16x128xf32> to vector<16x128xbf16>
    %c1 = arith.constant 1 : index
    %c0_9 = arith.constant 0 : index
    %c0_10 = arith.constant 0 : index
    %12 = vector.load %arg3[%c1, %c0_9, %c0_10] : memref<5x128x128xbf16, #tpu.memory_space<vmem>>, vector<1x128x128xbf16>
    %13 = vector.shape_cast %12 : vector<1x128x128xbf16> to vector<128x128xbf16>
    %cst_11 = arith.constant dense<0.000000e+00> : vector<16x128xf32>
    %14 = tpu.matmul %11, %13, %cst_11 {dimension_numbers = #tpu.dot_dimension_numbers<[1], [0], [0], [1], [0, 0, 1, 1], [], []>} : vector<16x128xbf16>, vector<128x128xbf16>, vector<16x128xf32> -> vector<16x128xf32>
    %15 = arith.truncf %14 : vector<16x128xf32> to vector<16x128xbf16>
    %cst_12 = arith.constant dense<0.000000e+00> : vector<16x128xf32>
    %16 = tpu.matmul %0, %15, %cst_12 {dimension_numbers = #tpu.dot_dimension_numbers<[1], [0], [0], [1], [0, 0, 1, 1], [], []>} : vector<16x16xbf16>, vector<16x128xbf16>, vector<16x128xf32> -> vector<16x128xf32>
    %c1_13 = arith.constant 1 : index
    %c0_14 = arith.constant 0 : index
    %17 = vector.load %arg4[%c1_13, %c0_14] : memref<8x128xf32, #tpu.memory_space<vmem>>, vector<1x128xf32>
    %18 = vector.broadcast %17 : vector<1x128xf32> to vector<16x128xf32>
    %19 = arith.addf %16, %18 : vector<16x128xf32>
    %20 = math.tanh %19 : vector<16x128xf32>
    %21 = arith.truncf %20 : vector<16x128xf32> to vector<16x128xbf16>
    %c2 = arith.constant 2 : index
    %c0_15 = arith.constant 0 : index
    %c0_16 = arith.constant 0 : index
    %22 = vector.load %arg3[%c2, %c0_15, %c0_16] : memref<5x128x128xbf16, #tpu.memory_space<vmem>>, vector<1x128x128xbf16>
    %23 = vector.shape_cast %22 : vector<1x128x128xbf16> to vector<128x128xbf16>
    %cst_17 = arith.constant dense<0.000000e+00> : vector<16x128xf32>
    %24 = tpu.matmul %21, %23, %cst_17 {dimension_numbers = #tpu.dot_dimension_numbers<[1], [0], [0], [1], [0, 0, 1, 1], [], []>} : vector<16x128xbf16>, vector<128x128xbf16>, vector<16x128xf32> -> vector<16x128xf32>
    %25 = arith.truncf %24 : vector<16x128xf32> to vector<16x128xbf16>
    %cst_18 = arith.constant dense<0.000000e+00> : vector<16x128xf32>
    %26 = tpu.matmul %0, %25, %cst_18 {dimension_numbers = #tpu.dot_dimension_numbers<[1], [0], [0], [1], [0, 0, 1, 1], [], []>} : vector<16x16xbf16>, vector<16x128xbf16>, vector<16x128xf32> -> vector<16x128xf32>
    %c2_19 = arith.constant 2 : index
    %c0_20 = arith.constant 0 : index
    %27 = vector.load %arg4[%c2_19, %c0_20] : memref<8x128xf32, #tpu.memory_space<vmem>>, vector<1x128xf32>
    %28 = vector.broadcast %27 : vector<1x128xf32> to vector<16x128xf32>
    %29 = arith.addf %26, %28 : vector<16x128xf32>
    %30 = math.tanh %29 : vector<16x128xf32>
    %31 = arith.addf %10, %20 : vector<16x128xf32>
    %32 = arith.addf %31, %30 : vector<16x128xf32>
    %c0_21 = arith.constant 0 : index
    %c0_22 = arith.constant 0 : index
    %33 = vector.load %arg6[%c0_21, %c0_22] : memref<16x128xf32, #tpu.memory_space<vmem>>, vector<16x128xf32>
    tpu.vector_store %arg6[%c0_21, %c0_22], %32 {strides = array<i32>} : memref<16x128xf32, #tpu.memory_space<vmem>>, vector<16x128xf32>,
    %cst_23 = arith.constant 0.000000e+00 : f32
    %34 = vector.broadcast %cst_23 : f32 to vector<8x128xf32>
    %c0_24 = arith.constant 0 : index
    %c0_25 = arith.constant 0 : index
    %35 = vector.load %arg7[%c0_24, %c0_25] : memref<8x128xf32, #tpu.memory_space<vmem>>, vector<8x128xf32>
    tpu.vector_store %arg7[%c0_24, %c0_25], %34 {strides = array<i32>} : memref<8x128xf32, #tpu.memory_space<vmem>>, vector<8x128xf32>,
    %c0_26 = arith.constant 0 : index
    %36 = memref.load %arg0[%c0_26] : memref<2xi32, #tpu.memory_space<smem>>
    %37 = arith.index_cast %36 : i32 to index
    %c0_27 = arith.constant 0 : index
    %38 = vector.load %arg6[%37, %c0_27] : memref<16x128xf32, #tpu.memory_space<vmem>>, vector<1x128xf32>
    %c0_28 = arith.constant 0 : index
    %c0_29 = arith.constant 0 : index
    %39 = vector.load %arg7[%c0_28, %c0_29] : memref<8x128xf32, #tpu.memory_space<vmem>>, vector<1x128xf32>
    tpu.vector_store %arg7[%c0_28, %c0_29], %38 {strides = array<i32>} : memref<8x128xf32, #tpu.memory_space<vmem>>, vector<1x128xf32>,
    %c1_30 = arith.constant 1 : index
    %40 = memref.load %arg0[%c1_30] : memref<2xi32, #tpu.memory_space<smem>>
    %41 = arith.index_cast %40 : i32 to index
    %c0_31 = arith.constant 0 : index
    %42 = vector.load %arg6[%41, %c0_31] : memref<16x128xf32, #tpu.memory_space<vmem>>, vector<1x128xf32>
    %c1_32 = arith.constant 1 : index
    %c0_33 = arith.constant 0 : index
    %43 = vector.load %arg7[%c1_32, %c0_33] : memref<8x128xf32, #tpu.memory_space<vmem>>, vector<1x128xf32>
    tpu.vector_store %arg7[%c1_32, %c0_33], %42 {strides = array<i32>} : memref<8x128xf32, #tpu.memory_space<vmem>>, vector<1x128xf32>,
    %c0_34 = arith.constant 0 : index
    %c0_35 = arith.constant 0 : index
    %44 = vector.load %arg7[%c0_34, %c0_35] : memref<8x128xf32, #tpu.memory_space<vmem>>, vector<8x128xf32>
    %45 = arith.truncf %44 : vector<8x128xf32> to vector<8x128xbf16>
    %c3 = arith.constant 3 : index
    %c0_36 = arith.constant 0 : index
    %c0_37 = arith.constant 0 : index
    %46 = vector.load %arg3[%c3, %c0_36, %c0_37] : memref<5x128x128xbf16, #tpu.memory_space<vmem>>, vector<1x128x128xbf16>
    %47 = vector.shape_cast %46 : vector<1x128x128xbf16> to vector<128x128xbf16>
    %cst_38 = arith.constant dense<0.000000e+00> : vector<8x128xf32>
    %48 = tpu.matmul %45, %47, %cst_38 {dimension_numbers = #tpu.dot_dimension_numbers<[1], [0], [0], [1], [0, 0, 1, 1], [], []>} : vector<8x128xbf16>, vector<128x128xbf16>, vector<8x128xf32> -> vector<8x128xf32>
    %c3_39 = arith.constant 3 : index
    %c0_40 = arith.constant 0 : index
    %49 = vector.load %arg4[%c3_39, %c0_40] : memref<8x128xf32, #tpu.memory_space<vmem>>, vector<1x128xf32>
    %50 = vector.broadcast %49 : vector<1x128xf32> to vector<8x128xf32>
    %51 = arith.addf %48, %50 : vector<8x128xf32>
    %cst_41 = arith.constant 0.000000e+00 : f32
    %52 = vector.broadcast %cst_41 : f32 to vector<8x128xf32>
    %53 = arith.maximumf %51, %52 : vector<8x128xf32>
    %54 = arith.truncf %53 : vector<8x128xf32> to vector<8x128xbf16>
    %c4 = arith.constant 4 : index
    %c0_42 = arith.constant 0 : index
    %c0_43 = arith.constant 0 : index
    %55 = vector.load %arg3[%c4, %c0_42, %c0_43] : memref<5x128x128xbf16, #tpu.memory_space<vmem>>, vector<1x128x128xbf16>
    %56 = vector.shape_cast %55 : vector<1x128x128xbf16> to vector<128x128xbf16>
    %cst_44 = arith.constant dense<0.000000e+00> : vector<8x128xf32>
    %57 = tpu.matmul %54, %56, %cst_44 {dimension_numbers = #tpu.dot_dimension_numbers<[1], [0], [0], [1], [0, 0, 1, 1], [], []>} : vector<8x128xbf16>, vector<128x128xbf16>, vector<8x128xf32> -> vector<8x128xf32>
    %c4_45 = arith.constant 4 : index
    %c0_46 = arith.constant 0 : index
    %58 = vector.load %arg4[%c4_45, %c0_46] : memref<8x128xf32, #tpu.memory_space<vmem>>, vector<1x128xf32>
    %59 = vector.broadcast %58 : vector<1x128xf32> to vector<8x128xf32>
    %60 = arith.addf %57, %59 : vector<8x128xf32>
    %cst_47 = arith.constant dense<0xFF800000> : vector<8xf32>
    %61 = vector.multi_reduction <maximumf>, %60, %cst_47 [1] : vector<8x128xf32> to vector<8xf32>
    %62 = vector.shape_cast %61 : vector<8xf32> to vector<8x1xf32>
    %63 = vector.broadcast %62 : vector<8x1xf32> to vector<8x128xf32>
    %64 = arith.subf %60, %63 : vector<8x128xf32>
    %65 = math.exp %64 : vector<8x128xf32>
    %cst_48 = arith.constant dense<0.000000e+00> : vector<8xf32>
    %66 = vector.multi_reduction <add>, %65, %cst_48 [1] : vector<8x128xf32> to vector<8xf32>
    %67 = vector.shape_cast %66 : vector<8xf32> to vector<8x1xf32>
    %68 = math.log %67 : vector<8x1xf32>
    %69 = arith.addf %68, %62 : vector<8x1xf32>
    %70 = vector.broadcast %69 : vector<8x1xf32> to vector<8x128xf32>
    %71 = arith.subf %60, %70 : vector<8x128xf32>
    %72 = vector.extract_strided_slice %51 {offsets = [0, 0], sizes = [2, 128], strides = [1, 1]} : vector<8x128xf32> to vector<2x128xf32>
    %73 = vector.extract_strided_slice %71 {offsets = [0, 0], sizes = [2, 128], strides = [1, 1]} : vector<8x128xf32> to vector<2x128xf32>
    %cst_49 = arith.constant 0.000000e+00 : f32
    %74 = vector.broadcast %cst_49 : f32 to vector<4x128xf32>
    %75 = tpu.concatenate %72, %73, %74 in 0 : vector<2x128xf32>, vector<2x128xf32>, vector<4x128xf32> -> vector<8x128xf32>
    %c0_50 = arith.constant 0 : index
    %c0_51 = arith.constant 0 : index
    %76 = vector.load %arg5[%c0_50, %c0_51] : memref<8x128xf32, #tpu.memory_space<vmem>>, vector<8x128xf32>
    tpu.vector_store %arg5[%c0_50, %c0_51], %75 {strides = array<i32>} : memref<8x128xf32, #tpu.memory_space<vmem>>, vector<8x128xf32>,
    return
  }
}

</mosaic_0001>

<bundles_post_ra>
// kernel: net_forward.1
= control target key start
LH: loop header
LB: loop body
LE: loop exit
PB: predicated region body
PF: predicated region fallthrough
CT: control target
= control target key end

     0   :  { %s1359_s0 = inlined_call_operand.vmem [shape: s32[2], index: 0, kind: input, shape index: {}]   ;;  %s1360_s1 = inlined_call_operand.vmem [shape: bf16[16,16], index: 1, kind: input, shape index: {}]   ;;  %s1361_s2 = inlined_call_operand.hbm [shape: bf16[16,128], index: 2, kind: input, shape index: {}]   ;;  %s1362_s3 = inlined_call_operand.hbm [shape: bf16[5,128,128], index: 3, kind: input, shape index: {}]   ;;  %s1363_s4 = inlined_call_operand.hbm [shape: f32[8,128], index: 4, kind: input, shape index: {}]   ;;  %s1364_s5 = inlined_call_operand.vmem [shape: f32[8,128], index: 5, kind: output, shape index: {}]  }
   0x1   :  { %s10_s20 = sshll.u32 %s1359_s0, 4  ;;  %s11_s20 = int_to_ptr.vmem [resolvable:$true] %s10_s20 }
   0x2   :  { %s1101_s21 = scalar_lea.vmem %s11_s20, 16  ;;  %p1106_p1 = scmp.lt.s32.totalorder %s11_s20, %s11_s20 }
   0x3   :  { %p1102_p0 = scmp.ne.s32.totalorder %s11_s20, %s1101_s21  ;;  %p1107_p2 = scmp.lt.s32.totalorder %s1101_s21, %s1101_s21 }
   0x5   :  { %p1108_p3 = por %p1107_p2, %p1106_p1 }
   0x7   :  { %p1109_p4 = pnand %p1108_p3, %p1102_p0 }
   0x9   :  { %1112 = shalt.err (!%p1109_p4)  }
   0xa   :  { %s1185_s22 = smov [#allocation5]  }
   0xb   :  { %13 = dma.vmem_to_smem %s11_s20, 16, %s1185_s22, [#allocation4] }
   0xc   :  { %1179 = dma.done.wait [#allocation4], 16 }
   0xd   :  { %1180 = vsyncadd [#allocation4], 4294967280 }
   0xe   :  { %15 = sfence }
   0xf   :  { %16 = vsyncpa [#allocation7], 0 }
  0x10   :  { %17 = vsyncpa [#allocation9], 0  ;;  %s1186_s23 = smov [#allocation8]   ;;  %s1187_s25 = smov [#allocation6]  }
  0x11   :  { %s37_s24 = sshll.u32 %s1186_s23, 4  ;;  %s25_s26 = sshll.u32 %s1187_s25, 4  ;;  %s38_s24 = int_to_ptr.vmem [resolvable:$true] %s37_s24  ;;  %s1226_s26 = int_to_ptr.vmem [resolvable:$true] %s25_s26 }
  0x12   :  { %s1113_s28 = scalar_lea.hbm %s1362_s3, 5120 }
  0x13   :  { %p1114_p5 = scmp.ne.s32.totalorder %s1362_s3, %s1113_s28  ;;  %p1117_p6 = scmp.lt.u32.totalorder %s1113_s28, %s1362_s3 }
  0x15   :  { %p1119_p7 = pnand %p1117_p6, %p1114_p5 }
  0x17   :  { %1122 = shalt.err (!%p1119_p7)
}
  0x18   :  { %s1123_s8 = scalar_lea.vmem %s38_s24, 5120  ;;  %p1128_p9 = scmp.lt.s32.totalorder %s38_s24, %s38_s24 }
  0x19   :  { %p1124_p8 = scmp.ne.s32.totalorder %s38_s24, %s1123_s8  ;;  %p1129_p10 = scmp.lt.s32.totalorder %s1123_s8, %s1123_s8 }
  0x1b   :  { %p1130_p11 = por %p1129_p10, %p1128_p9 }
  0x1d   :  { %p1131_p12 = pnand %p1130_p11, %p1124_p8 }
  0x1f   :  { %1134 = shalt.err (!%p1131_p12)
}
  0x20   :  { %s1188_s9 = smov 64   ;;  %s1189_s10 = smov 4  }
  0x21   :  { %43 = dma.hbm_to_vmem [thread:$0]  %s1362_s3, 5120, %s38_s24, [#allocation9], %s1188_s9, %s1188_s9, %s1189_s10  }
  0x22   :  { %s1135_s15 = scalar_lea.hbm %s1361_s2, 128 }
  0x23   :  { %p1136_p13 = scmp.ne.s32.totalorder %s1361_s2, %s1135_s15  ;;  %p1139_p0 = scmp.lt.u32.totalorder %s1135_s15, %s1361_s2 }
  0x25   :  { %p1141_p1 = pnand %p1139_p0, %p1136_p13 }
  0x27   :  { %1144 = shalt.err (!%p1141_p1)
}
  0x28   :  { %s1145_s20 = scalar_lea.vmem %s1226_s26, 128  ;;  %p1150_p3 = scmp.lt.s32.totalorder %s1226_s26, %s1226_s26 }
  0x29   :  { %p1146_p2 = scmp.ne.s32.totalorder %s1226_s26, %s1145_s20  ;;  %p1151_p4 = scmp.lt.s32.totalorder %s1145_s20, %s1145_s20 }
  0x2b   :  { %p1152_p5 = por %p1151_p4, %p1150_p3 }
  0x2d   :  { %p1153_p6 = pnand %p1152_p5, %p1146_p2 }
  0x2f   :  { %1156 = shalt.err (!%p1153_p6)
}
  0x30   :  { %31 = dma.hbm_to_vmem [thread:$0]  %s1361_s2, 128, %s1226_s26, [#allocation7], %s1188_s9, %s1188_s9, %s1189_s10  }
  0x31   :  { %s1190_s22 = smov [#allocation10]   ;;  %s1157_s0 = scalar_lea.hbm %s1363_s4, 128 }
  0x32   :  { %s50_s23 = sshll.u32 %s1190_s22, 4  ;;  %p1158_p7 = scmp.ne.s32.totalorder %s1363_s4, %s1157_s0  ;;  %s51_s23 = int_to_ptr.vmem [resolvable:$true] %s50_s23 }
  0x33   :  { %p1161_p8 = scmp.lt.u32.totalorder %s1157_s0, %s1363_s4 }
  0x35   :  { %p1163_p9 = pnand %p1161_p8, %p1158_p7 }
  0x37   :  { %1166 = shalt.err (!%p1163_p9)
}
  0x38   :  { %s1167_s6 = scalar_lea.vmem %s51_s23, 128  ;;  %p1172_p11 = scmp.lt.s32.totalorder %s51_s23, %s51_s23 }
  0x39   :  { %p1168_p10 = scmp.ne.s32.totalorder %s51_s23, %s1167_s6  ;;  %p1173_p12 = scmp.lt.s32.totalorder %s1167_s6, %s1167_s6 }
  0x3b   :  { %p1174_p13 = por %p1173_p12, %p1172_p11 }
  0x3d   :  { %p1175_p0 = pnand %p1174_p13, %p1168_p10 }
  0x3f   :  { %1178 = shalt.err (!%p1175_p0)
}
  0x40   :  { %53 = dma.hbm_to_vmem [thread:$0]  %s1363_s4, 128, %s51_s23, [#allocation9]  }
  0x41   :  { %1181 = dma.done.wait [#allocation7], 128  }
  0x42   :  { %1182 = vsyncadd [#allocation7], 4294967168 }
  0x43   :  { %1183 = dma.done.wait [#allocation9], 5248  }
  0x44   :  { %1184 = vsyncadd [#allocation9], 4294962048  ;;  %v1191_v0 = vmov 0.0   ;;  %vm1192_vm0 = vmmov 0   ;;  %v1043_v1 = vld [vmem:[#allocation6] sm:$0xff]   ;;  %v1279_v2 = vld [vmem:[%s1360_s1] sm:$0xff]  }
  0x45   :  { %917 = vmatprep.subr.bf16.mxu1 %v1191_v0  ;;  %555 = vst [vmem:[#allocation3] sm:$0xff] %v1191_v0  ;;  %919 = vmatprep.mubr.msk.bf16.mxu1 %vm1192_vm0, %v1191_v0  ;;  %vm79_vm1 = vcmask 130048   ;;  %v1045_v3 = vld [vmem:[#allocation8] sm:$0xff]   ;;  %v1046_v4 = vld [vmem:[#allocation8 + $0x8] sm:$0xff]   ;;  %v1047_v5 = vld [vmem:[#allocation8 + $0x10] sm:$0xff]   ;;  %s556_s1 = sld [smem:[#allocation5]] }
  0x46   :  { %943 = vmatprep.subr.bf16.mxu0 %v1191_v0  ;;  %959 = vmatprep.mubr.msk.bf16.mxu0 %vm1192_vm0, %v1191_v0  ;;  %v1048_v6 = vld [vmem:[#allocation8 + $0x18] sm:$0xff]   ;;  %v1049_v7 = vld [vmem:[#allocation8 + $0x20] sm:$0xff]   ;;  %v1050_v8 = vld [vmem:[#allocation8 + $0x28] sm:$0xff]   ;;  %s847_s8 = sld [smem:[#allocation5 + $0x1]]  ;;  %vm802_vm2 = vcmask 1041408   ;;  %vm804_vm3 = vcmask 1043456  }
  0x47   :  { %918 = vmatpush3.bf16.msra.mxu1 %v1043_v1  ;;  %v1051_v9 = vld [vmem:[#allocation8 + $0x30] sm:$0xff]   ;;  %v1052_v10 = vld [vmem:[#allocation8 + $0x38] sm:$0xff]   ;;  %v1053_v11 = vld [vmem:[#allocation8 + $0x40] sm:$0xff]  }
  0x48   :  { %923 = vmatprep.subr.bf16.mxu1 %v1191_v0  ;;  %944 = vmatpush3.bf16.msra.mxu0 %v1053_v11  ;;  %v1054_v12 = vld [vmem:[#allocation8 + $0x48] sm:$0xff]   ;;  %v1055_v13 = vld [vmem:[#allocation8 + $0x50] sm:$0xff]   ;;  %v1056_v14 = vld [vmem:[#allocation8 + $0x58] sm:$0xff]  }
  0x49   :  { %945 = vmatprep.subr.bf16.mxu0 %v1191_v0  ;;  %v1057_v20 = vld [vmem:[#allocation8 + $0x60] sm:$0xff]   ;;  %v1058_v21 = vld [vmem:[#allocation8 + $0x68] sm:$0xff]   ;;  %v1059_v22 = vld [vmem:[#allocation8 + $0x70] sm:$0xff]  }
  0x4a   :  { %920 = vmatmul.mubr.msk.bf16.vlgmr.msra.gmra.mrb[0].mxu1 %vm79_vm1, %v1279_v2  ;;  %v1060_v23 = vld [vmem:[#allocation8 + $0x78] sm:$0xff]   ;;  %v818_v24 = vld [vmem:[#allocation10] ss:$0 sm:$0xff]  ;;  %v1062_v35 = vld [vmem:[#allocation8 + $0x88] sm:$0xff]  }
  0x4b   :  { %924 = vmatpush3.bf16.msra.mxu1 %v1045_v3  ;;  %939 = vmatprep.mubr.msk.bf16.mxu1 %vm1192_vm0, %v1191_v0  ;;  %v1061_v34 = vld [vmem:[#allocation8 + $0x80] sm:$0xff]   ;;  %v1063_v36 = vld [vmem:[#allocation8 + $0x90] sm:$0xff]   ;;  %v1064_v37 = vld [vmem:[#allocation8 + $0x98] sm:$0xff]   ;;  %s557_s9 = scalar_lea.vmem [#allocation2], %s556_s1 }
  0x4c   :  { %925 = vmatprep.subr.bf16.mxu1 %v1191_v0  ;;  %946 = vmatpush3.bf16.msra.mxu0 %v1054_v12  ;;  %v1065_v43 = vld [vmem:[#allocation8 + $0xa0] sm:$0xff]   ;;  %v1066_v44 = vld [vmem:[#allocation8 + $0xa8] sm:$0xff]   ;;  %v1067_v45 = vld [vmem:[#allocation8 + $0xb0] sm:$0xff]   ;;  %s561_s10 = scalar_lea.vmem [#allocation2], %s847_s8 }
  0x4d   :  { %947 = vmatprep.subr.bf16.mxu0 %v1191_v0  ;;  %v1068_v46 = vld [vmem:[#allocation8 + $0xb8] sm:$0xff]   ;;  %v835_v47 = vld [vmem:[#allocation10 + $0x1] ss:$0 sm:$0xff]  ;;  %v1070_v63 = vld [vmem:[#allocation8 + $0xc8] sm:$0xff]  }
  0x4e   :  { %v1069_v62 = vld [vmem:[#allocation8 + $0xc0] sm:$0xff]   ;;  %v1071_v1 = vld [vmem:[#allocation8 + $0xd0] sm:$0xff]   ;;  %v1072_v3 = vld [vmem:[#allocation8 + $0xd8] sm:$0xff]  }
  0x4f   :  { %926 = vmatpush3.bf16.msra.mxu1 %v1046_v4  ;;  %v1074_v4 = vld [vmem:[#allocation8 + $0xe8] sm:$0xff]   ;;  %v1081_v11 = vld [vmem:[#allocation8 + $0x120] sm:$0xff]  }
  0x50   :  { %927 = vmatprep.subr.bf16.mxu1 %v1191_v0  ;;  %948 = vmatpush3.bf16.msra.mxu0 %v1055_v13  ;;  %v1082_v12 = vld [vmem:[#allocation8 + $0x128] sm:$0xff]   ;;  %v845_v13 = vld [vmem:[#allocation10 + $0x2] ss:$0 sm:$0xff] }
  0x51   :  { %949 = vmatprep.subr.bf16.mxu0 %v1191_v0 }
  0x53   :  { %928 = vmatpush3.bf16.msra.mxu1 %v1047_v5  ;;  %v1075_v5 = vld [vmem:[#allocation8 + $0xf0] sm:$0xff]  }
  0x54   :  { %929 = vmatprep.subr.bf16.mxu1 %v1191_v0  ;;  %950 = vmatpush3.bf16.msra.mxu0 %v1056_v14 }
  0x55   :  { %951 = vmatprep.subr.bf16.mxu0 %v1191_v0 }
  0x57   :  { %930 = vmatpush3.bf16.msra.mxu1 %v1048_v6  ;;  %v1076_v6 = vld [vmem:[#allocation8 + $0xf8] sm:$0xff]  }
  0x58   :  { %931 = vmatprep.subr.bf16.mxu1 %v1191_v0  ;;  %952 = vmatpush3.bf16.msra.mxu0 %v1057_v20 }
  0x59   :  { %953 = vmatprep.subr.bf16.mxu0 %v1191_v0 }
  0x5b   :  { %932 = vmatpush3.bf16.msra.mxu1 %v1049_v7  ;;  %v1077_v7 = vld [vmem:[#allocation8 + $0x100] sm:$0xff]  }
  0x5c   :  { %933 = vmatprep.subr.bf16.mxu1 %v1191_v0  ;;  %954 = vmatpush3.bf16.msra.mxu0 %v1058_v21 }
  0x5d   :  { %955 = vmatprep.subr.bf16.mxu0 %v1191_v0 }
  0x5f   :  { %934 = vmatpush3.bf16.msra.mxu1 %v1050_v8  ;;  %v1078_v8 = vld [vmem:[#allocation8 + $0x108] sm:$0xff]  }
  0x60   :  { %935 = vmatprep.subr.bf16.mxu1 %v1191_v0  ;;  %956 = vmatpush3.bf16.msra.mxu0 %v1059_v22 }
  0x61   :  { %957 = vmatprep.subr.bf16.mxu0 %v1191_v0 }
  0x63   :  { %936 = vmatpush3.bf16.msra.mxu1 %v1051_v9  ;;  %v1079_v9 = vld [vmem:[#allocation8 + $0x110] sm:$0xff]  }
  0x64   :  { %937 = vmatprep.subr.bf16.mxu1 %v1191_v0  ;;  %958 = vmatpush3.bf16.msra.mxu0 %v1060_v23 }
  0x65   :  { %969 = vmatprep.subr.bf16.mxu0 %v1191_v0 }
  0x67   :  { %938 = vmatpush3.bf16.msra.mxu1 %v1052_v10  ;;  %v1080_v10 = vld [vmem:[#allocation8 + $0x118] sm:$0xff]  }
  0x68   :  { %963 = vmatprep.subr.bf16.mxu1 %v1191_v0 }
 0x11d   :  { %v117_v15 = vpop.f32.mrb[0].mxu1 }
 0x11e   :  { %v921_v16 = vpop.f32.mrb[1].mxu1 }
 0x11f   :  { %v120_v17 = vpop.f32.mrb[2].mxu1 }
 0x120   :  { %v124_v18 = vpack.c.bf16 %v120_v17, %v117_v15  ;;  %v922_v19 = vpop.f32.mrb[3].mxu1 }
 0x122   :  { %940 = vmatmul.mubr.bf16.vlgmr.msra.gmra.mrb[4].mxu1 %v124_v18 }
 0x123   :  { %965 = vmatprep.mubr.msk.bf16.mxu1 %vm1192_vm0, %v1191_v0 }
 0x1f5   :  { %v228_v25 = vpop.f32.mrb[4].mxu1 }
 0x1f6   :  { %v229_v26 = vadd.f32 %v818_v24, %v228_v25  ;;  %v941_v27 = vpop.f32.mrb[5].mxu1 }
 0x1f7   :  { %v231_v28 = vpop.f32.mrb[6].mxu1 }
 0x1f8   :  { %v232_v29 = vadd.f32 %v818_v24, %v231_v28  ;;  %v942_v30 = vpop.f32.mrb[7].mxu1  ;;  %1085 = vtanh.f32 %v229_v26 }
 0x1f9   :  { %v1083_v30 = vld [vmem:[#allocation8 + $0x130] sm:$0xff]  }
 0x1fa   :  { %1087 = vtanh.f32 %v232_v29 }
 0x202   :  { %v1304_v31 = vpop.eup %1085 }
 0x204   :  { %v1306_v32 = vpop.eup %1087 }
 0x205   :  { %v237_v33 = vpack.c.bf16 %v1306_v32, %v1304_v31 }
 0x207   :  { %960 = vmatmul.mubr.bf16.vlgmr.msra.gmra.mrb[0].mxu0 %v237_v33 }
 0x208   :  { %985 = vmatprep.mubr.msk.bf16.mxu0 %vm1192_vm0, %v1191_v0  ;;  %970 = vmatpush3.bf16.msra.mxu0 %v1061_v34 }
 0x209   :  { %971 = vmatprep.subr.bf16.mxu0 %v1191_v0 }
 0x20c   :  { %972 = vmatpush3.bf16.msra.mxu0 %v1062_v35 }
 0x20d   :  { %973 = vmatprep.subr.bf16.mxu0 %v1191_v0 }
 0x210   :  { %974 = vmatpush3.bf16.msra.mxu0 %v1063_v36 }
 0x211   :  { %975 = vmatprep.subr.bf16.mxu0 %v1191_v0 }
 0x214   :  { %976 = vmatpush3.bf16.msra.mxu0 %v1064_v37 }
 0x215   :  { %977 = vmatprep.subr.bf16.mxu0 %v1191_v0 }
 0x218   :  { %978 = vmatpush3.bf16.msra.mxu0 %v1065_v43 }
 0x219   :  { %979 = vmatprep.subr.bf16.mxu0 %v1191_v0 }
 0x21c   :  { %980 = vmatpush3.bf16.msra.mxu0 %v1066_v44 }
 0x21d   :  { %981 = vmatprep.subr.bf16.mxu0 %v1191_v0 }
 0x220   :  { %982 = vmatpush3.bf16.msra.mxu0 %v1067_v45 }
 0x221   :  { %983 = vmatprep.subr.bf16.mxu0 %v1191_v0 }
 0x224   :  { %984 = vmatpush3.bf16.msra.mxu0 %v1068_v46 }
 0x225   :  { %1015 = vmatprep.subr.bf16.mxu0 %v1191_v0 }
 0x2da   :  { %v337_v38 = vpop.f32.mrb[0].mxu0 }
 0x2db   :  { %v961_v39 = vpop.f32.mrb[1].mxu0 }
 0x2dc   :  { %v340_v40 = vpop.f32.mrb[2].mxu0 }
 0x2dd   :  { %v344_v41 = vpack.c.bf16 %v340_v40, %v337_v38  ;;  %v962_v42 = vpop.f32.mrb[3].mxu0  ;;  %v857_v40 = vld [vmem:[#allocation10 + $0x4] ss:$0 sm:$0xff] }
 0x2df   :  { %964 = vmatpush3.bf16.msra.mxu1 %v344_v41 }
 0x2e0   :  { %989 = vmatprep.subr.bf16.mxu1 %v1191_v0 }
 0x2e2   :  { %966 = vmatmul.mubr.msk.bf16.vlgmr.msra.gmra.mrb[8].mxu1 %vm79_vm1, %v1279_v2 }
 0x2e3   :  { %991 = vmatprep.mubr.msk.bf16.mxu1 %vm1192_vm0, %v1191_v0 }
 0x3b5   :  { %v384_v48 = vpop.f32.mrb[8].mxu1 }
 0x3b6   :  { %v385_v49 = vadd.f32 %v835_v47, %v384_v48  ;;  %v967_v50 = vpop.f32.mrb[9].mxu1 }
 0x3b7   :  { %v387_v51 = vpop.f32.mrb[10].mxu1 }
 0x3b8   :  { %v388_v52 = vadd.f32 %v835_v47, %v387_v51  ;;  %v968_v53 = vpop.f32.mrb[11].mxu1  ;;  %1089 = vtanh.f32 %v385_v49 }
 0x3ba   :  { %1091 = vtanh.f32 %v388_v52 }
 0x3c2   :  { %v1325_v54 = vpop.eup %1089 }
 0x3c3   :  { %v549_v20 = vadd.f32 %v1325_v54, %v1304_v31  ;;  %v1084_v31 = vld [vmem:[#allocation8 + $0x138] sm:$0xff]  }
 0x3c4   :  { %v1327_v55 = vpop.eup %1091 }
 0x3c5   :  { %v393_v56 = vpack.c.bf16 %v1327_v55, %v1325_v54  ;;  %v550_v22 = vadd.f32 %v1327_v55, %v1306_v32  ;;  %v848_v32 = vld [vmem:[#allocation10 + $0x3] ss:$0 sm:$0xff] }
 0x3c7   :  { %986 = vmatmul.mubr.bf16.vlgmr.msra.gmra.mrb[4].mxu0 %v393_v56 }
 0x3c8   :  { %1031 = vmatprep.mubr.msk.bf16.mxu0 %vm1192_vm0, %v1191_v0  ;;  %1016 = vmatpush3.bf16.msra.mxu0 %v1077_v7 }
 0x3c9   :  { %1017 = vmatprep.subr.bf16.mxu0 %v1191_v0 }
 0x3cc   :  { %1018 = vmatpush3.bf16.msra.mxu0 %v1078_v8 }
 0x3cd   :  { %1019 = vmatprep.subr.bf16.mxu0 %v1191_v0 }
 0x3d0   :  { %1020 = vmatpush3.bf16.msra.mxu0 %v1079_v9 }
 0x3d1   :  { %1021 = vmatprep.subr.bf16.mxu0 %v1191_v0 }
 0x3d4   :  { %1022 = vmatpush3.bf16.msra.mxu0 %v1080_v10 }
 0x3d5   :  { %1023 = vmatprep.subr.bf16.mxu0 %v1191_v0 }
 0x3d8   :  { %1024 = vmatpush3.bf16.msra.mxu0 %v1081_v11 }
 0x3d9   :  { %1025 = vmatprep.subr.bf16.mxu0 %v1191_v0 }
 0x3dc   :  { %1026 = vmatpush3.bf16.msra.mxu0 %v1082_v12 }
 0x3dd   :  { %1027 = vmatprep.subr.bf16.mxu0 %v1191_v0 }
 0x3e0   :  { %1028 = vmatpush3.bf16.msra.mxu0 %v1083_v30 }
 0x3e1   :  { %1029 = vmatprep.subr.bf16.mxu0 %v1191_v0 }
 0x3e4   :  { %1030 = vmatpush3.bf16.msra.mxu0 %v1084_v31 }
 0x49a   :  { %v493_v57 = vpop.f32.mrb[4].mxu0 }
 0x49b   :  { %v987_v58 = vpop.f32.mrb[5].mxu0 }
 0x49c   :  { %v496_v59 = vpop.f32.mrb[6].mxu0 }
 0x49d   :  { %v500_v60 = vpack.c.bf16 %v496_v59, %v493_v57  ;;  %v988_v61 = vpop.f32.mrb[7].mxu0 }
 0x49f   :  { %990 = vmatpush3.bf16.msra.mxu1 %v500_v60 }
 0x4a0   :  { %995 = vmatprep.subr.bf16.mxu1 %v1191_v0 }
 0x4a2   :  { %992 = vmatmul.mubr.msk.bf16.vlgmr.msra.gmra.mrb[12].mxu1 %vm79_vm1, %v1279_v2  ;;  %v1073_v2 = vld [vmem:[#allocation8 + $0xe0] sm:$0xff]  }
 0x4a3   :  { %1011 = vmatprep.mubr.msk.bf16.mxu1 %vm1192_vm0, %v1191_v0  ;;  %996 = vmatpush3.bf16.msra.mxu1 %v1069_v62 }
 0x4a4   :  { %997 = vmatprep.subr.bf16.mxu1 %v1191_v0 }
 0x4a7   :  { %998 = vmatpush3.bf16.msra.mxu1 %v1070_v63 }
 0x4a8   :  { %999 = vmatprep.subr.bf16.mxu1 %v1191_v0 }
 0x4ab   :  { %1000 = vmatpush3.bf16.msra.mxu1 %v1071_v1 }
 0x4ac   :  { %1001 = vmatprep.subr.bf16.mxu1 %v1191_v0 }
 0x4af   :  { %1002 = vmatpush3.bf16.msra.mxu1 %v1072_v3 }
 0x4b0   :  { %1003 = vmatprep.subr.bf16.mxu1 %v1191_v0 }
 0x4b3   :  { %1004 = vmatpush3.bf16.msra.mxu1 %v1073_v2 }
 0x4b4   :  { %1005 = vmatprep.subr.bf16.mxu1 %v1191_v0 }
 0x4b7   :  { %1006 = vmatpush3.bf16.msra.mxu1 %v1074_v4 }
 0x4b8   :  { %1007 = vmatprep.subr.bf16.mxu1 %v1191_v0 }
 0x4bb   :  { %1008 = vmatpush3.bf16.msra.mxu1 %v1075_v5 }
 0x4bc   :  { %1009 = vmatprep.subr.bf16.mxu1 %v1191_v0 }
 0x4bf   :  { %1010 = vmatpush3.bf16.msra.mxu1 %v1076_v6 }
 0x575   :  { %v540_v14 = vpop.f32.mrb[12].mxu1 }
 0x576   :  { %v541_v15 = vadd.f32 %v845_v13, %v540_v14  ;;  %v993_v16 = vpop.f32.mrb[13].mxu1 }
 0x577   :  { %v543_v17 = vpop.f32.mrb[14].mxu1 }
 0x578   :  { %1093 = vtanh.f32 %v541_v15  ;;  %v544_v18 = vadd.f32 %v845_v13, %v543_v17  ;;  %v994_v19 = vpop.f32.mrb[15].mxu1 }
 0x57a   :  { %1095 = vtanh.f32 %v544_v18 }
 0x582   :  { %v1094_v21 = vpop.eup %1093 }
 0x583   :  { %v551_v23 = vadd.f32 %v1094_v21, %v549_v20 }
 0x584   :  { %v1096_v24 = vpop.eup %1095 }
 0x585   :  { %553 = vst [vmem:[#allocation2] sm:$0xff] %v551_v23  ;;  %v552_v25 = vadd.f32 %v1096_v24, %v550_v22 }
 0x587   :  { %554 = vst [vmem:[#allocation2 + $0x8] sm:$0xff] %v552_v25 }
 0x58e   :  { %v558_v26 = vld [vmem:[%s557_s9] sm:$0x1] }
 0x58f   :  { %v562_v27 = vld [vmem:[%s561_s10] sm:$0x1]  ;;  %559 = vst [vmem:[#allocation3] sm:$0x1] %v558_v26 }
 0x590   :  { %563 = vst [vmem:[#allocation3 + $0x1] sm:$0x1] %v562_v27 }
 0x597   :  { %v564_v28 = vld [vmem:[#allocation3] sm:$0xff] }
 0x598   :  { %v565_v29 = vpack.c.bf16 %v564_v28, %v564_v28 }
 0x59a   :  { %1012 = vmatmul.mubr.bf16.vlgmr.msra.gmra.mrb[16].mxu1 %v565_v29 }
 0x66d   :  { %v670_v33 = vpop.f32.mrb[16].mxu1 }
 0x66e   :  { %v671_v34 = vadd.f32 %v848_v32, %v670_v33  ;;  %v1013_v35 = vpop.f32.mrb[17].mxu1 }
 0x66f   :  { %v673_v36 = vpop.f32.mrb[18].mxu1 }
 0x670   :  { %v676_v37 = vmax.f32 %v671_v34, 0.0  ;;  %v1014_v38 = vpop.f32.mrb[19].mxu1 }
 0x672   :  { %v677_v39 = vpack.c.bf16 %v676_v37, %v676_v37 }
 0x674   :  { %1032 = vmatmul.mubr.bf16.vlgmr.msra.gmra.mrb[8].mxu0 %v677_v39 }
 0x747   :  { %v782_v41 = vpop.f32.mrb[8].mxu0 }
 0x748   :  { %v783_v42 = vadd.f32 %v857_v40, %v782_v41  ;;  %v1033_v43 = vpop.f32.mrb[9].mxu0 }
 0x749   :  { %v785_v44 = vpop.f32.mrb[10].mxu0 }
 0x74a   :  { %788 = vmax.xlane.f32.xlu0 %v783_v42  ;;  %v1034_v45 = vpop.f32.mrb[11].mxu0 }
 0x7d7   :  { %v789_v46 = vpop.xlane.xlu0 %788 }
 0x7d8   :  { %v790_v0 = vsub.f32 %v783_v42, %v789_v46 }
 0x7da   :  { %v791_v47 = vmul.f32 1.442695, %v790_v0 }
 0x7dc   :  { %1097 = vpow2.f32 %v791_v47 }
 0x7e6   :  { %v1098_v48 = vpop.eup %1097 }
 0x7e7   :  { %793 = vadd.xlane.f32.xlu0 %v1098_v48 }
 0x874   :  { %v794_v49 = vpop.xlane.xlu0 %793 }
 0x875   :  { %1099 = vlog2.f32 %v794_v49 }
 0x87f   :  { %v1100_v50 = vpop.eup %1099 }
 0x880   :  { %v796_v51 = vmul.f32 0.6931472, %v1100_v50 }
 0x882   :  { %v797_v52 = vadd.f32 %v796_v51, %v789_v46 }
 0x884   :  { %v798_v53 = vsub.f32 %v783_v42, %v797_v52 }
 0x886   :  { %v800_v54 = vrot.slane %v798_v53, 6 }
 0x888   :  { %v803_v55 = vsel %vm802_vm2, %v671_v34, %v800_v54 }
 0x889   :  { %v805_v56 = vsel %vm804_vm3, %v803_v55, 0.0 }
 0x88a   :  { %806 = vst [vmem:[%s1364_s5] sm:$0xff] %v805_v56 }
 0x88b   :  { %811 = vsyncpa [#allocation7], 1 }
 0x88c   :  { %812 = vsyncpa [#allocation9], 1 }

</bundles_post_ra>
